<compile_context>
chip_gen: v6e
topology: v6e:2x2x1
jax: 0.10.0
libtpu: 0.0.40
codegen_flags: <defaults>
</compile_context>

<pallas_src>
import functools

import jax
import jax.numpy as jnp
from jax import lax
from jax.experimental import pallas as pl
from jax.experimental.pallas import tpu as pltpu


def _round_up(x, m):
    return ((x + m - 1) // m) * m


def _vmem_capacity_bytes():
    """Per-core VMEM capacity; conservative fallback = v7x's 64 MiB per TC."""
    try:
        cap = getattr(pltpu.get_tpu_info(), "vmem_capacity_bytes", None)
        if cap:
            return int(cap)
    except Exception:
        pass
    return 64 * 1024 * 1024


def _pick_batch_block(N, in_bytes_per_batch, out_bytes_per_batch, budget):
    """Batches per grid step.

    Budgets the FULL double-buffered working set (x_even + x_odd + output slab,
    x2 for the pipeline's double buffers).  For problems with enough work it
    keeps >= 2 'parallel' grid steps so v7x's two TensorCores are both used.
    B always divides N so every block is full (no masked remainder needed).
    """
    per_batch = 2 * (in_bytes_per_batch + out_bytes_per_batch)
    b_max = max(1, budget // per_batch)
    B = int(min(N, b_max))
    if B == N and N >= 2 and N * in_bytes_per_batch >= (1 << 20):
        B = (N + 1) // 2          # leave >= 2 steps for the two v7x TCs
    while N % B:
        B -= 1
    return B


def down_kernel(xe_ref, xo_ref, w_ref, bias_ref, lmask_ref, rmask_ref, o_ref,
                *, block_b):
    """One grid step = `block_b` batches.

    xe_ref/xo_ref : (B, C_in_pad, Lp_pad)   even / odd length positions
    w_ref         : (C_out_pad, 3*C_in_pad) BN-folded im2col conv weight
    bias_ref      : (C_out_pad, 1)          folded conv-bias + BN bias (f32)
    lmask_ref     : (1, Lp_pad)             0 at position 0, 1 elsewhere
    rmask_ref     : (1, Lp_pad)             0 at position Lp-1, 1 elsewhere
    o_ref         : (B, C_out_pad, Lp_pad)  lane-dense (128-aligned) output
    """
    lp_pad = xe_ref.shape[2]
    w = w_ref[...]
    bias = bias_ref[...]
    lmask = lmask_ref[...]
    rmask = rmask_ref[...]

    def body(b, carry):
        # ---- MaxPool1d(2): a single VPU max of the even/odd slabs ----
        pooled = jnp.maximum(xe_ref[b], xo_ref[b])          # (C_in_pad, Lp_pad)

        # ---- Conv1d(k=3, pad=1) taps via XLU lane rotation (no unaligned
        # concat/slice copies).  Masks applied unconditionally: roll wraps. ----
        left = pltpu.roll(pooled, shift=1, axis=1) * lmask            # p[l-1]
        right = pltpu.roll(pooled, shift=lp_pad - 1, axis=1) * rmask  # p[l+1]

        # ---- im2col: ONE MXU matmul, K = 3*C_in_pad.  The tap stack is a
        # tile-aligned sublane concat (C_in_pad is a multiple of 8/16). ----
        stacked = jnp.concatenate([left, pooled, right], axis=0)
        acc = jnp.dot(w, stacked, preferred_element_type=jnp.float32)

        # ---- folded BatchNorm bias + ReLU (scale already in the weight) ----
        o_ref[b] = jnp.maximum(acc + bias, 0.0).astype(o_ref.dtype)
        return carry

    lax.fori_loop(0, block_b, body, 0, unroll=block_b <= 8)


def down_forward(x, w, b_conv, gamma, beta, mean, var, eps=1e-5, *, use_bf16=False):
    """Forward of Down: MaxPool1d(2) -> Conv1d(3, pad=1) -> BatchNorm1d(eval) -> ReLU."""
    N, C_in, L = x.shape
    C_out = w.shape[0]
    Lp = L // 2                       # MaxPool1d(2) floors odd lengths
    assert Lp >= 1, "MaxPool1d(2) needs L >= 2"
    L2 = 2 * Lp

    act_dtype = jnp.bfloat16 if use_bf16 else x.dtype
    out_dtype = x.dtype
    sub_in = 8 * (4 // jnp.dtype(act_dtype).itemsize)    # 8 for f32, 16 for bf16
    sub_out = 8 * (4 // jnp.dtype(out_dtype).itemsize)
    C_in_pad = _round_up(C_in, sub_in)
    C_out_pad = _round_up(C_out, sub_out)
    Lp_pad = _round_up(Lp, 128)       # 128-lane-aligned output -> unmasked vst

    # ---- fold BatchNorm (eval) into the conv: scale -> weight, rest -> bias ----
    scale = gamma / jnp.sqrt(var + eps)                              # (C_out,)
    w_f = (w * scale[:, None, None]).astype(jnp.float32)             # (C_out, C_in, 3)
    bias = ((b_conv - mean) * scale + beta).astype(jnp.float32)      # (C_out,)

    # im2col weight with taps leading, channel dim padded to the sublane tile:
    # w_im2col[o, k*C_in_pad + c] == w_f[o, c, k]
    w_t = jnp.pad(jnp.transpose(w_f, (0, 2, 1)),
                  ((0, C_out_pad - C_out), (0, 0), (0, C_in_pad - C_in)))
    w_im2col = w_t.reshape(C_out_pad, 3 * C_in_pad).astype(act_dtype)
    bias2d = jnp.pad(bias, (0, C_out_pad - C_out)).reshape(C_out_pad, 1)

    # ---- activations: even/odd deinterleave + pad (+ optional bf16 cast).
    # Kept as ONE fused XLA pass over x: lane-stride-2 loads are not reliably
    # lowerable in Mosaic, but all transposes are gone (3-D blocks keep the
    # module's native (N, C, L) order), and bf16 halves the DMA bytes. ----
    x2 = x[:, :, :L2].astype(act_dtype)
    pad = ((0, 0), (0, C_in_pad - C_in), (0, Lp_pad - Lp))
    x_even = jnp.pad(x2[:, :, 0::2], pad)                 # (N, C_in_pad, Lp_pad)
    x_odd = jnp.pad(x2[:, :, 1::2], pad)

    # ---- precomputed conv edge masks (hoisted out of the per-step path) ----
    pos = jnp.arange(Lp_pad, dtype=jnp.int32)
    lmask = (pos != 0).astype(act_dtype).reshape(1, Lp_pad)
    rmask = (pos != Lp - 1).astype(act_dtype).reshape(1, Lp_pad)

    # ---- block-size / VMEM budgeting (adapts to v5e/v6e 128 MiB, v7x 64 MiB) ----
    in_bytes = 2 * C_in_pad * Lp_pad * jnp.dtype(act_dtype).itemsize   # xe + xo
    out_bytes = C_out_pad * Lp_pad * jnp.dtype(out_dtype).itemsize
    vmem_cap = _vmem_capacity_bytes()
    vmem_limit = min((vmem_cap * 3) // 4, 100 * 1024 * 1024)
    B = _pick_batch_block(N, in_bytes, out_bytes, budget=(vmem_limit * 3) // 5)
    grid = (N // B,)
    # NOTE: very large C*Lp per batch (single-batch slab > budget) would need an
    # additional length-dim tiling with a 1-element halo; not required here.

    out_pad = pl.pallas_call(
        functools.partial(down_kernel, block_b=B),
        out_shape=jax.ShapeDtypeStruct((N, C_out_pad, Lp_pad), out_dtype),
        grid=grid,
        in_specs=[
            pl.BlockSpec((B, C_in_pad, Lp_pad), lambda g: (g, 0, 0)),
            pl.BlockSpec((B, C_in_pad, Lp_pad), lambda g: (g, 0, 0)),
            pl.BlockSpec((C_out_pad, 3 * C_in_pad), lambda g: (0, 0)),
            pl.BlockSpec((C_out_pad, 1), lambda g: (0, 0)),
            pl.BlockSpec((1, Lp_pad), lambda g: (0, 0)),
            pl.BlockSpec((1, Lp_pad), lambda g: (0, 0)),
        ],
        out_specs=pl.BlockSpec((B, C_out_pad, Lp_pad), lambda g: (g, 0, 0)),
        compiler_params=pltpu.CompilerParams(
            dimension_semantics=("parallel",),
            vmem_limit_bytes=int(vmem_limit),
        ),
    )(x_even, x_odd, w_im2col, bias2d, lmask, rmask)

    # strip the channel / lane padding; layout is already (N, C_out, Lp)
    return out_pad[:, :C_out, :Lp]


def ref_down(x, w, b_conv, gamma, beta, mean, var, eps):
    """Pure-JAX reference replicating the PyTorch forward (BN in eval mode)."""
    N, C_in, L = x.shape
    Lp = L // 2
    pooled = jnp.max(x[:, :, :2 * Lp].reshape(N, C_in, Lp, 2), axis=-1)
    padded = jnp.pad(pooled, ((0, 0), (0, 0), (1, 1)))
    out = jnp.zeros((N, w.shape[0], Lp), dtype=jnp.float32)
    for k in range(3):
        out = out + jnp.einsum('oc,ncl->nol', w[:, :, k], padded[:, :, k:k + Lp])
    out = out + b_conv[None, :, None]
    out = ((out - mean[None, :, None]) / jnp.sqrt(var[None, :, None] + eps)
           * gamma[None, :, None] + beta[None, :, None])
    return jnp.maximum(out, 0.0)


if __name__ == "__main__":
    # Small shapes consistent with Down(in_channels=4, out_channels=8), L=16.
    N, C_in, C_out, L = 2, 4, 8, 16
    eps = 1e-5

    key = jax.random.PRNGKey(0)
    kx, kw, kb = jax.random.split(key, 3)

    x = jax.random.normal(kx, (N, C_in, L), dtype=jnp.float32)

    # Deterministic parameter init (synthetic, not a checkpoint load).
    w = jax.random.normal(kw, (C_out, C_in, 3), dtype=jnp.float32) * 0.2
    b_conv = jax.random.normal(kb, (C_out,), dtype=jnp.float32) * 0.1
    gamma = 1.0 + 0.1 * jnp.arange(C_out, dtype=jnp.float32)
    beta = 0.05 * jnp.arange(C_out, dtype=jnp.float32)
    running_mean = 0.01 * jnp.arange(C_out, dtype=jnp.float32)
    running_var = 1.0 + 0.02 * jnp.arange(C_out, dtype=jnp.float32)

    ref = ref_down(x, w, b_conv, gamma, beta, running_mean, running_var, eps)

    # f32 path: strict check against the PyTorch-equivalent reference.
    out = down_forward(x, w, b_conv, gamma, beta, running_mean, running_var, eps)
    out = jax.block_until_ready(out)
    assert out.shape == (N, C_out, L // 2)
    assert jnp.allclose(out, ref, atol=1e-4, rtol=1e-4)

    # bf16 path: activations AND weights presented to the MXU in bf16 (halved
    # DMA bytes), f32 accumulation -> looser tolerance.
    out_bf16 = jax.block_until_ready(
        down_forward(x, w, b_conv, gamma, beta, running_mean, running_var, eps,
                     use_bf16=True))
    assert out_bf16.shape == (N, C_out, L // 2)
    assert jnp.allclose(out_bf16, ref, atol=7.5e-2, rtol=7.5e-2)

    print("KERNEL_OK")
</pallas_src>

<mosaic_0001>
module attributes {stable_mosaic.version = 11 : i64} {
  func.func @down_kernel(%arg0: i32, %arg1: memref<2x8x128xf32, #tpu.memory_space<vmem>>, %arg2: memref<2x8x128xf32, #tpu.memory_space<vmem>>, %arg3: memref<8x24xf32, #tpu.memory_space<vmem>>, %arg4: memref<8x1xf32, #tpu.memory_space<vmem>>, %arg5: memref<1x128xf32, #tpu.memory_space<vmem>>, %arg6: memref<1x128xf32, #tpu.memory_space<vmem>>, %arg7: memref<2x8x128xf32, #tpu.memory_space<vmem>>) attributes {dimension_semantics = [#tpu.dimension_semantics<parallel>], iteration_bounds = array<i64: 1>, scalar_prefetch = 0 : i64, scratch_operands = 0 : i64, tpu.core_type = #tpu.core_type<tc>, window_params = [{transform_indices = @transform_0, window_bounds = array<i64: 2, 8, 128>}, {transform_indices = @transform_1, window_bounds = array<i64: 2, 8, 128>}, {pipeline_mode = #tpu.pipeline_mode<synchronous>, transform_indices = @transform_2, window_bounds = array<i64: 8, 24>}, {pipeline_mode = #tpu.pipeline_mode<synchronous>, transform_indices = @transform_3, window_bounds = array<i64: 8, 1>}, {pipeline_mode = #tpu.pipeline_mode<synchronous>, transform_indices = @transform_4, window_bounds = array<i64: 1, 128>}, {pipeline_mode = #tpu.pipeline_mode<synchronous>, transform_indices = @transform_5, window_bounds = array<i64: 1, 128>}, {transform_indices = @transform_6, window_bounds = array<i64: 2, 8, 128>}]} {
    %c0 = arith.constant 0 : index
    %c0_0 = arith.constant 0 : index
    %0 = vector.load %arg3[%c0, %c0_0] : memref<8x24xf32, #tpu.memory_space<vmem>>, vector<8x24xf32>
    %c0_1 = arith.constant 0 : index
    %c0_2 = arith.constant 0 : index
    %1 = vector.load %arg4[%c0_1, %c0_2] : memref<8x1xf32, #tpu.memory_space<vmem>>, vector<8x1xf32>
    %c0_3 = arith.constant 0 : index
    %c0_4 = arith.constant 0 : index
    %2 = vector.load %arg5[%c0_3, %c0_4] : memref<1x128xf32, #tpu.memory_space<vmem>>, vector<1x128xf32>
    %c0_5 = arith.constant 0 : index
    %c0_6 = arith.constant 0 : index
    %3 = vector.load %arg6[%c0_5, %c0_6] : memref<1x128xf32, #tpu.memory_space<vmem>>, vector<1x128xf32>
    %c0_i32 = arith.constant 0 : i32
    %4 = arith.index_cast %c0_i32 : i32 to index
    %c0_7 = arith.constant 0 : index
    %c0_8 = arith.constant 0 : index
    %5 = vector.load %arg1[%4, %c0_7, %c0_8] : memref<2x8x128xf32, #tpu.memory_space<vmem>>, vector<1x8x128xf32>
    %6 = vector.shape_cast %5 : vector<1x8x128xf32> to vector<8x128xf32>
    %7 = arith.index_cast %c0_i32 : i32 to index
    %c0_9 = arith.constant 0 : index
    %c0_10 = arith.constant 0 : index
    %8 = vector.load %arg2[%7, %c0_9, %c0_10] : memref<2x8x128xf32, #tpu.memory_space<vmem>>, vector<1x8x128xf32>
    %9 = vector.shape_cast %8 : vector<1x8x128xf32> to vector<8x128xf32>
    %10 = arith.maximumf %6, %9 : vector<8x128xf32>
    %c1_i32 = arith.constant 1 : i32
    %11 = tpu.dynamic_rotate %10 by %c1_i32 dim 1 : vector<8x128xf32>, i32 -> vector<8x128xf32>
    %12 = vector.broadcast %2 : vector<1x128xf32> to vector<8x128xf32>
    %13 = arith.mulf %11, %12 : vector<8x128xf32>
    %c127_i32 = arith.constant 127 : i32
    %14 = tpu.dynamic_rotate %10 by %c127_i32 dim 1 : vector<8x128xf32>, i32 -> vector<8x128xf32>
    %15 = vector.broadcast %3 : vector<1x128xf32> to vector<8x128xf32>
    %16 = arith.mulf %14, %15 : vector<8x128xf32>
    %17 = tpu.concatenate %13, %10, %16 in 0 : vector<8x128xf32>, vector<8x128xf32>, vector<8x128xf32> -> vector<24x128xf32>
    %cst = arith.constant dense<0.000000e+00> : vector<8x128xf32>
    %18 = tpu.matmul %0, %17, %cst {dimension_numbers = #tpu.dot_dimension_numbers<[1], [0], [0], [1], [0, 0, 1, 1], [], []>} : vector<8x24xf32>, vector<24x128xf32>, vector<8x128xf32> -> vector<8x128xf32>
    %19 = vector.broadcast %1 : vector<8x1xf32> to vector<8x128xf32>
    %20 = arith.addf %18, %19 : vector<8x128xf32>
    %cst_11 = arith.constant 0.000000e+00 : f32
    %21 = vector.broadcast %cst_11 : f32 to vector<8x128xf32>
    %22 = arith.maximumf %20, %21 : vector<8x128xf32>
    %23 = arith.index_cast %c0_i32 : i32 to index
    %c0_12 = arith.constant 0 : index
    %c0_13 = arith.constant 0 : index
    %24 = vector.load %arg7[%23, %c0_12, %c0_13] : memref<2x8x128xf32, #tpu.memory_space<vmem>>, vector<1x8x128xf32>
    %25 = vector.shape_cast %24 : vector<1x8x128xf32> to vector<8x128xf32>
    %26 = vector.shape_cast %22 : vector<8x128xf32> to vector<1x8x128xf32>
    tpu.vector_store %arg7[%23, %c0_12, %c0_13], %26 {strides = array<i32>} : memref<2x8x128xf32, #tpu.memory_space<vmem>>, vector<1x8x128xf32>,
    %c1_i32_14 = arith.constant 1 : i32
    %27 = arith.index_cast %c1_i32_14 : i32 to index
    %c0_15 = arith.constant 0 : index
    %c0_16 = arith.constant 0 : index
    %28 = vector.load %arg1[%27, %c0_15, %c0_16] : memref<2x8x128xf32, #tpu.memory_space<vmem>>, vector<1x8x128xf32>
    %29 = vector.shape_cast %28 : vector<1x8x128xf32> to vector<8x128xf32>
    %30 = arith.index_cast %c1_i32_14 : i32 to index
    %c0_17 = arith.constant 0 : index
    %c0_18 = arith.constant 0 : index
    %31 = vector.load %arg2[%30, %c0_17, %c0_18] : memref<2x8x128xf32, #tpu.memory_space<vmem>>, vector<1x8x128xf32>
    %32 = vector.shape_cast %31 : vector<1x8x128xf32> to vector<8x128xf32>
    %33 = arith.maximumf %29, %32 : vector<8x128xf32>
    %c1_i32_19 = arith.constant 1 : i32
    %34 = tpu.dynamic_rotate %33 by %c1_i32_19 dim 1 : vector<8x128xf32>, i32 -> vector<8x128xf32>
    %35 = vector.broadcast %2 : vector<1x128xf32> to vector<8x128xf32>
    %36 = arith.mulf %34, %35 : vector<8x128xf32>
    %c127_i32_20 = arith.constant 127 : i32
    %37 = tpu.dynamic_rotate %33 by %c127_i32_20 dim 1 : vector<8x128xf32>, i32 -> vector<8x128xf32>
    %38 = vector.broadcast %3 : vector<1x128xf32> to vector<8x128xf32>
    %39 = arith.mulf %37, %38 : vector<8x128xf32>
    %40 = tpu.concatenate %36, %33, %39 in 0 : vector<8x128xf32>, vector<8x128xf32>, vector<8x128xf32> -> vector<24x128xf32>
    %cst_21 = arith.constant dense<0.000000e+00> : vector<8x128xf32>
    %41 = tpu.matmul %0, %40, %cst_21 {dimension_numbers = #tpu.dot_dimension_numbers<[1], [0], [0], [1], [0, 0, 1, 1], [], []>} : vector<8x24xf32>, vector<24x128xf32>, vector<8x128xf32> -> vector<8x128xf32>
    %42 = vector.broadcast %1 : vector<8x1xf32> to vector<8x128xf32>
    %43 = arith.addf %41, %42 : vector<8x128xf32>
    %cst_22 = arith.constant 0.000000e+00 : f32
    %44 = vector.broadcast %cst_22 : f32 to vector<8x128xf32>
    %45 = arith.maximumf %43, %44 : vector<8x128xf32>
    %46 = arith.index_cast %c1_i32_14 : i32 to index
    %c0_23 = arith.constant 0 : index
    %c0_24 = arith.constant 0 : index
    %47 = vector.load %arg7[%46, %c0_23, %c0_24] : memref<2x8x128xf32, #tpu.memory_space<vmem>>, vector<1x8x128xf32>
    %48 = vector.shape_cast %47 : vector<1x8x128xf32> to vector<8x128xf32>
    %49 = vector.shape_cast %45 : vector<8x128xf32> to vector<1x8x128xf32>
    tpu.vector_store %arg7[%46, %c0_23, %c0_24], %49 {strides = array<i32>} : memref<2x8x128xf32, #tpu.memory_space<vmem>>, vector<1x8x128xf32>,
    %c2_i32 = arith.constant 2 : i32
    return
  }
  func.func @transform_0(%arg0: i32) -> (i32, i32, i32) {
    %c0_i32 = arith.constant 0 : i32
    %c0_i32_0 = arith.constant 0 : i32
    %c0_i32_1 = arith.constant 0 : i32
    return %arg0, %c0_i32, %c0_i32_0 : i32, i32, i32
  }
  func.func @transform_1(%arg0: i32) -> (i32, i32, i32) {
    %c0_i32 = arith.constant 0 : i32
    %c0_i32_0 = arith.constant 0 : i32
    %c0_i32_1 = arith.constant 0 : i32
    return %arg0, %c0_i32, %c0_i32_0 : i32, i32, i32
  }
  func.func @transform_2(%arg0: i32) -> (i32, i32) {
    %c0_i32 = arith.constant 0 : i32
    %c0_i32_0 = arith.constant 0 : i32
    %c0_i32_1 = arith.constant 0 : i32
    return %c0_i32, %c0_i32_0 : i32, i32
  }
  func.func @transform_3(%arg0: i32) -> (i32, i32) {
    %c0_i32 = arith.constant 0 : i32
    %c0_i32_0 = arith.constant 0 : i32
    %c0_i32_1 = arith.constant 0 : i32
    return %c0_i32, %c0_i32_0 : i32, i32
  }
  func.func @transform_4(%arg0: i32) -> (i32, i32) {
    %c0_i32 = arith.constant 0 : i32
    %c0_i32_0 = arith.constant 0 : i32
    %c0_i32_1 = arith.constant 0 : i32
    return %c0_i32, %c0_i32_0 : i32, i32
  }
  func.func @transform_5(%arg0: i32) -> (i32, i32) {
    %c0_i32 = arith.constant 0 : i32
    %c0_i32_0 = arith.constant 0 : i32
    %c0_i32_1 = arith.constant 0 : i32
    return %c0_i32, %c0_i32_0 : i32, i32
  }
  func.func @transform_6(%arg0: i32) -> (i32, i32, i32) {
    %c0_i32 = arith.constant 0 : i32
    %c0_i32_0 = arith.constant 0 : i32
    %c0_i32_1 = arith.constant 0 : i32
    return %arg0, %c0_i32, %c0_i32_0 : i32, i32, i32
  }
}

</mosaic_0001>

<bundles_post_ra>
// kernel: tpu_custom_call.1
= control target key start
LH: loop header
LB: loop body
LE: loop exit
PB: predicated region body
PF: predicated region fallthrough
CT: control target
= control target key end

     0   :  { %11 = vsyncpa [#allocation3], 0  ;;  %s442_s0 = inlined_call_operand.hbm [shape: f32[2,8,128], index: 0, kind: input, shape index: {}]   ;;  %s443_s1 = inlined_call_operand.hbm [shape: f32[2,8,128], index: 1, kind: input, shape index: {}]   ;;  %s444_s2 = inlined_call_operand.vmem [shape: f32[8,24], index: 2, kind: input, shape index: {}]   ;;  %s445_s3 = inlined_call_operand.vmem [shape: f32[8,1], index: 3, kind: input, shape index: {}]   ;;  %s446_s4 = inlined_call_operand.vmem [shape: f32[1,128], index: 4, kind: input, shape index: {}]   ;;  %s447_s5 = inlined_call_operand.vmem [shape: f32[1,128], index: 5, kind: input, shape index: {}]   ;;  %s448_s6 = inlined_call_operand.hbm [shape: f32[2,8,128], index: 6, kind: output, shape index: {}]  }
   0x1   :  { %12 = vsyncpa [#allocation6], 0 }
   0x2   :  { %13 = vsyncpa [#allocation4], 0  ;;  %s367_s21 = smov [#allocation2]  }
   0x3   :  { %s19_s22 = sshll.u32 %s367_s21, 4  ;;  %s20_s22 = int_to_ptr.vmem [resolvable:$true] %s19_s22 }
   0x4   :  { %s309_s23 = scalar_lea.vmem %s20_s22, 256  ;;  %p314_p1 = scmp.lt.s32.totalorder %s20_s22, %s20_s22 }
   0x5   :  { %p310_p0 = scmp.ne.s32.totalorder %s20_s22, %s309_s23  ;;  %p315_p2 = scmp.lt.s32.totalorder %s309_s23, %s309_s23 }
   0x7   :  { %p316_p3 = por %p315_p2, %p314_p1 }
   0x9   :  { %p317_p4 = pnand %p316_p3, %p310_p0 }
   0xb   :  { %320 = shalt.err (!%p317_p4)
}
   0xc   :  { %s368_s24 = smov 128   ;;  %s369_s25 = smov 8  }
   0xd   :  { %25 = dma.hbm_to_vmem [thread:$0]  %s442_s0, 256, %s20_s22, [#allocation3], %s368_s24, %s368_s24, %s369_s25  }
   0xe   :  { %s370_s28 = smov [#allocation5]  }
   0xf   :  { %s31_s29 = sshll.u32 %s370_s28, 4  ;;  %s32_s29 = int_to_ptr.vmem [resolvable:$true] %s31_s29 }
  0x10   :  { %s329_s30 = scalar_lea.vmem %s32_s29, 256  ;;  %p334_p6 = scmp.lt.s32.totalorder %s32_s29, %s32_s29 }
  0x11   :  { %p330_p5 = scmp.ne.s32.totalorder %s32_s29, %s329_s30  ;;  %p335_p7 = scmp.lt.s32.totalorder %s329_s30, %s329_s30 }
  0x13   :  { %p336_p8 = por %p335_p7, %p334_p6 }
  0x15   :  { %p337_p9 = pnand %p336_p8, %p330_p5 }
  0x17   :  { %340 = shalt.err (!%p337_p9)
}
  0x18   :  { %37 = dma.hbm_to_vmem [thread:$0]  %s443_s1, 256, %s32_s29, [#allocation6], %s368_s24, %s368_s24, %s369_s25  }
  0x19   :  { %361 = dma.done.wait [#allocation3], 256  }
  0x1a   :  { %362 = vsyncadd [#allocation3], 4294967040 }
  0x1b   :  { %363 = dma.done.wait [#allocation6], 256  }
  0x1c   :  { %364 = vsyncadd [#allocation6], 4294967040  ;;  %v371_v0 = vmov 0.0   ;;  %vm372_vm0 = vmmov 0   ;;  %v56_v1 = vld [vmem:[#allocation2] sm:$0xff]  ;;  %v57_v2 = vld [vmem:[#allocation5] sm:$0xff] }
  0x1d   :  { %272 = vmatprep.subr.mxu0 %v371_v0  ;;  %281 = vmatprep.subr.mxu1 %v371_v0  ;;  %v159_v3 = vld [vmem:[#allocation2 + $0x8] sm:$0xff]  ;;  %v58_v4 = vmax.f32 %v56_v1, %v57_v2  ;;  %v161_v5 = vld [vmem:[#allocation5 + $0x8] sm:$0xff]  ;;  %v373_v6 = vmov 0   ;;  %s374_s0 = smov 127   ;;  %s375_s1 = smov 1   ;;  %v53_v8 = vld [vmem:[%s445_s3] sm:$0xff] }
  0x1e   :  { %278 = vmatprep.mubr.msk.f32.mxu0 %vm372_vm0, %v371_v0  ;;  %287 = vmatprep.mubr.msk.f32.mxu1 %vm372_vm0, %v371_v0  ;;  %v162_v7 = vmax.f32 %v159_v3, %v161_v5  ;;  %v261_v9 = vld [vmem:[%s447_s5] ss:$0 sm:$0xff]  ;;  %vm82_vm1 = vcmask 195584  }
  0x1f   :  { %300 = vset.pattern.permute.xlu0 %v373_v6  ;;  %59 = vrot.lane.b32.xlu1 %v58_v4, %s375_s1  ;;  %v260_v12 = vld [vmem:[%s446_s4] ss:$0 sm:$0xff]  ;;  %s376_s4 = smov [#allocation7]  }
  0x20   :  { %68 = vrot.lane.b32.xlu0 %v58_v4, %s374_s0  ;;  %v52_v18 = vld [vmem:[%s444_s2] sm:$0xff]  ;;  %s247_s5 = sshll.u32 %s376_s4, 4  ;;  %s248_s5 = int_to_ptr.vmem [resolvable:$true] %s247_s5 }
  0x21   :  { %s341_s2 = scalar_lea.vmem %s248_s5, 256  ;;  %p346_p11 = scmp.lt.s32.totalorder %s248_s5, %s248_s5 }
  0x22   :  { %p342_p10 = scmp.ne.s32.totalorder %s248_s5, %s341_s2  ;;  %p347_p12 = scmp.lt.s32.totalorder %s341_s2, %s341_s2 }
  0x23   :  { %163 = vrot.lane.b32.xlu1 %v162_v7, %s375_s1 }
  0x24   :  { %166 = vrot.lane.b32.xlu0 %v162_v7, %s374_s0  ;;  %p348_p13 = por %p347_p12, %p346_p11 }
  0x26   :  { %p349_p0 = pnand %p348_p13, %p342_p10 }
  0x28   :  { %79 = vperm.xlu0 %300, %v53_v8  }
  0x91   :  { %v60_v11 = vpop.permute.xlu1 %59 }
  0x92   :  { %v69_v10 = vpop.permute.xlu0 %68  ;;  %v67_v14 = vmul.f32 %v260_v12, %v60_v11 }
  0x93   :  { %v76_v13 = vmul.f32 %v261_v9, %v69_v10 }
  0x95   :  { %273 = vmatpush3.msra.mxu0 %v76_v13  ;;  %v164_v16 = vpop.permute.xlu1 %163 }
  0x96   :  { %v167_v15 = vpop.permute.xlu0 %166  ;;  %274 = vmatprep.subr.mxu0 %v371_v0  ;;  %v165_v19 = vmul.f32 %v260_v12, %v164_v16 }
  0x97   :  { %v168_v17 = vmul.f32 %v261_v9, %v167_v15  ;;  %275 = vmatpush3.msra.mxu0 %v58_v4 }
  0x98   :  { %276 = vmatprep.subr.mxu0 %v371_v0 }
  0x99   :  { %277 = vmatpush3.msra.mxu0 %v67_v14  ;;  %282 = vmatpush3.msra.mxu1 %v168_v17 }
  0x9a   :  { %283 = vmatprep.subr.mxu1 %v371_v0  ;;  %279 = vmatmul.mubr.msk.f32.vlgmr.msra.gmra.mxu0 %vm82_vm1, %v52_v18 }
  0x9b   :  { %284 = vmatpush3.msra.mxu1 %v162_v7 }
  0x9c   :  { %285 = vmatprep.subr.mxu1 %v371_v0 }
  0x9d   :  { %286 = vmatpush3.msra.mxu1 %v165_v19 }
  0x9e   :  { %288 = vmatmul.mubr.msk.f32.vlgmr.msra.gmra.mxu1 %vm82_vm1, %v52_v18 }
  0xa3   :  { %v80_v20 = vpop.permute.xlu0 %79 }
 0x15a   :  { %v152_v21 = vpop.f32.mrf.mxu0 }
 0x15b   :  { %v153_v22 = vadd.f32 %v152_v21, %v80_v20 }
 0x15c   :  { %v280_v23 = vpop.f32.mrf.mxu0 }
 0x15d   :  { %v156_v24 = vmax.f32 %v153_v22, 0.0 }
 0x15e   :  { %v235_v25 = vpop.f32.mrf.mxu1 }
 0x15f   :  { %157 = vst [vmem:[#allocation7] sm:$0xff] %v156_v24  ;;  %v236_v26 = vadd.f32 %v235_v25, %v80_v20 }
 0x160   :  { %v289_v27 = vpop.f32.mrf.mxu1 }
 0x161   :  { %v239_v28 = vmax.f32 %v236_v26, 0.0 }
 0x163   :  { %241 = vst [vmem:[#allocation7 + $0x8] sm:$0xff] %v239_v28 }
 0x164   :  { %352 = shalt.err (!%p349_p0)
}
 0x165   :  { %253 = dma.vmem_to_hbm [thread:$0]  %s248_s5, 256, %s448_s6, [#allocation4], %s368_s24, %s368_s24, %s369_s25  }
 0x166   :  { %365 = dma.done.wait [#allocation4], 256  }
 0x167   :  { %366 = vsyncadd [#allocation4], 4294967040 }
 0x168   :  { %257 = vsyncpa [#allocation3], 1 }
 0x169   :  { %258 = vsyncpa [#allocation6], 1 }
 0x16a   :  { %259 = vsyncpa [#allocation4], 1 }

</bundles_post_ra>
